<compile_context>
chip_gen: v5e
topology: v5e:2x2
jax: 0.10.0
libtpu: 0.0.40
codegen_flags: <defaults>
</compile_context>

<pallas_src>
import functools
import math

import jax
import jax.numpy as jnp
from jax import lax
from jax.experimental import pallas as pl
from jax.experimental.pallas import tpu as pltpu


def _round_up(n, m):
    return (n + m - 1) // m * m


def _rnn_kernel(num_layers, T, Bp, *refs):
    """refs = proj0, w_hh_0, [w_ih_l, bias_l, w_hh_l | l=1..L-1], fc_w, fc_b,
              out_ref, hN_ref, h_seq (scratch), proj (scratch).
    All operands are pre-transposed and zero-padded to (8,128) tiles by the wrapper.
    """
    proj0_ref = refs[0]
    w_hh_refs = [refs[1]]
    in_proj_refs = [None]                    # layer-0 projection was hoisted to XLA
    idx = 2
    for _ in range(1, num_layers):
        in_proj_refs.append((refs[idx], refs[idx + 1]))
        w_hh_refs.append(refs[idx + 2])
        idx += 3
    fc_w_ref, fc_b_ref = refs[idx], refs[idx + 1]
    out_ref, hN_ref = refs[idx + 2], refs[idx + 3]
    h_seq_ref, proj_ref = refs[idx + 4], refs[idx + 5]

    Hp = hN_ref.shape[2]

    for l in range(num_layers):
        w_hh = w_hh_refs[l][...]                               # (Hp, Hp), pre-transposed

        if l == 0:
            layer_proj_ref = proj0_ref                         # computed by XLA
        else:
            # Phase 1: ONE (T*Bp,Hp)@(Hp,Hp) matmul for all time steps + one bias add.
            # Reads h_seq (prev layer), writes proj -> Phase 2 may overwrite h_seq.
            w_ih_ref, b_ref = in_proj_refs[l]
            proj_ref[...] = (
                jnp.dot(h_seq_ref[...], w_ih_ref[...],
                        preferred_element_type=jnp.float32)
                + b_ref[...])
            layer_proj_ref = proj_ref

        # Phase 2: serial recurrence.  Only one (Bp,Hp)@(Hp,Hp) matmul + tanh on the
        # carried critical path; h lives in vregs via the loop carry.
        def rec_body(t, h, _proj=layer_proj_ref, _w_hh=w_hh):
            row = pl.multiple_of(t * Bp, Bp)
            h_new = jnp.tanh(
                _proj[pl.ds(row, Bp), :]
                + jnp.dot(h, _w_hh, preferred_element_type=jnp.float32))
            h_seq_ref[pl.ds(row, Bp), :] = h_new
            return h_new

        h_last = lax.fori_loop(0, T, rec_body,
                               jnp.zeros((Bp, Hp), jnp.float32),
                               unroll=min(T, 8))
        hN_ref[l] = h_last

    # Fused fc head: single lane-dense (T*Bp,Hp)@(Hp,Op) matmul; h_seq never hits HBM.
    out_ref[...] = (jnp.dot(h_seq_ref[...], fc_w_ref[...],
                            preferred_element_type=jnp.float32)
                    + fc_b_ref[...])


def rnn_forward(x, params):
    """x: (B, T, I) float32.  Returns (out (B*T, O), hN (L, B, H)) like RNNModel.forward."""
    B, T, I = x.shape
    layers = params["layers"]
    L = len(layers)
    H = layers[0][1].shape[0]
    O = params["fc_w"].shape[0]

    # Hardware-tile padding: batch -> sublane multiple (8 for f32), features -> 128 lanes.
    Bp = _round_up(B, 8)
    Hp = _round_up(H, 128)
    Op = _round_up(O, 128)

    # Layer-0 input projection hoisted to XLA, emitted time-major; zero-padded so the
    # padded batch rows / hidden lanes stay exactly zero through the recurrence.
    w_ih0, _, b_ih0, b_hh0 = layers[0]
    proj0 = jnp.einsum("bti,hi->tbh", x, w_ih0) + (b_ih0 + b_hh0)
    proj0 = jnp.pad(proj0, ((0, 0), (0, Bp - B), (0, Hp - H))).reshape(T * Bp, Hp)

    kernel_inputs = [proj0]
    for l, (w_ih, w_hh, b_ih, b_hh) in enumerate(layers):
        if l > 0:
            kernel_inputs.append(jnp.pad(w_ih.T, ((0, Hp - H), (0, Hp - H))))
            kernel_inputs.append(
                jnp.pad((b_ih + b_hh).reshape(1, H), ((0, 0), (0, Hp - H))))
        kernel_inputs.append(jnp.pad(w_hh.T, ((0, Hp - H), (0, Hp - H))))
    kernel_inputs.append(jnp.pad(params["fc_w"].T, ((0, Hp - H), (0, Op - O))))
    kernel_inputs.append(jnp.pad(params["fc_b"].reshape(1, O), ((0, 0), (0, Op - O))))

    out_shapes = [
        jax.ShapeDtypeStruct((T * Bp, Op), jnp.float32),   # fc output, time-major
        jax.ShapeDtypeStruct((L, Bp, Hp), jnp.float32),    # final hidden per layer
    ]
    scratch_shapes = [
        pltpu.VMEM((T * Bp, Hp), jnp.float32),             # h_seq of current layer
        pltpu.VMEM((T * Bp, Hp), jnp.float32),             # per-step input projections
    ]

    # Explicit scoped-VMEM budget from actual resident bytes (defaults: 16 MiB v5e /
    # 32 MiB v6e,v7x); cap with headroom under the v7x 64 MiB physical ceiling.
    f32_bytes = 4
    resident = (sum(math.prod(a.shape) for a in kernel_inputs)
                + sum(math.prod(s.shape) for s in out_shapes)
                + 2 * T * Bp * Hp) * f32_bytes
    vmem_limit = int(min(56 * 2 ** 20, max(16 * 2 ** 20, 2 * resident)))

    def vmem_spec():
        return pl.BlockSpec(memory_space=pltpu.MemorySpace.VMEM)

    out_pad, hN_pad = pl.pallas_call(
        functools.partial(_rnn_kernel, L, T, Bp),
        in_specs=[vmem_spec() for _ in kernel_inputs],
        out_specs=[vmem_spec(), vmem_spec()],
        out_shape=out_shapes,
        scratch_shapes=scratch_shapes,
        compiler_params=pltpu.CompilerParams(vmem_limit_bytes=vmem_limit),
    )(*kernel_inputs)

    # Relayout the small O-wide tensor (not the H-wide h_seq) to PyTorch's
    # output.contiguous().view(-1, hidden_size) row order (b*T + t).
    out = out_pad.reshape(T, Bp, Op)[:, :B, :O]
    out = jnp.transpose(out, (1, 0, 2)).reshape(B * T, O)
    hN = hN_pad[:, :B, :H]
    return out, hN


def _ref_forward(x, params):
    """Pure-JAX reference replicating nn.RNN(tanh, batch_first) + nn.Linear."""
    layers = params["layers"]
    L = len(layers)
    B, T, _ = x.shape
    H = layers[0][1].shape[0]
    h_final = []
    layer_in = x
    for l in range(L):
        w_ih, w_hh, b_ih, b_hh = layers[l]
        h = jnp.zeros((B, H), jnp.float32)
        hs = []
        for t in range(T):
            h = jnp.tanh(layer_in[:, t] @ w_ih.T + b_ih + h @ w_hh.T + b_hh)
            hs.append(h)
        layer_in = jnp.stack(hs, axis=1)
        h_final.append(h)
    out = layer_in.reshape(-1, H) @ params["fc_w"].T + params["fc_b"]
    return out, jnp.stack(h_final, axis=0)


def _init_params(key, input_size, hidden_size, output_size, num_layers):
    """Deterministic init mirroring PyTorch's U(-1/sqrt(H), 1/sqrt(H))."""
    bound = 1.0 / jnp.sqrt(jnp.float32(hidden_size))
    layers = []
    for l in range(num_layers):
        in_dim = input_size if l == 0 else hidden_size
        key, k1, k2, k3, k4 = jax.random.split(key, 5)
        layers.append((
            jax.random.uniform(k1, (hidden_size, in_dim), jnp.float32, -bound, bound),
            jax.random.uniform(k2, (hidden_size, hidden_size), jnp.float32, -bound, bound),
            jax.random.uniform(k3, (hidden_size,), jnp.float32, -bound, bound),
            jax.random.uniform(k4, (hidden_size,), jnp.float32, -bound, bound),
        ))
    key, kf1, kf2 = jax.random.split(key, 3)
    fc_w = jax.random.uniform(kf1, (output_size, hidden_size), jnp.float32, -bound, bound)
    fc_b = jax.random.uniform(kf2, (output_size,), jnp.float32, -bound, bound)
    return {"layers": layers, "fc_w": fc_w, "fc_b": fc_b}


if __name__ == "__main__":
    B, T = 2, 8                 # batch, sequence length
    I, H, O, L = 16, 32, 16, 2  # input_size, hidden_size, output_size, num_layers

    key = jax.random.PRNGKey(0)
    key, kx, kp = jax.random.split(key, 3)
    x = jax.random.normal(kx, (B, T, I), jnp.float32)
    params = _init_params(kp, I, H, O, L)

    fwd = jax.jit(rnn_forward)
    out, hN = jax.block_until_ready(fwd(x, params))

    assert out.shape == (B * T, O), out.shape
    assert hN.shape == (L, B, H), hN.shape

    out_ref, hN_ref = _ref_forward(x, params)
    assert jnp.allclose(out, out_ref, atol=1e-4, rtol=1e-4)
    assert jnp.allclose(hN, hN_ref, atol=1e-4, rtol=1e-4)

    print("KERNEL_OK")
</pallas_src>

<mosaic_0001>
module attributes {stable_mosaic.version = 11 : i64} {
  func.func @_rnn_kernel(%arg0: memref<64x128xf32, #tpu.memory_space<vmem>>, %arg1: memref<128x128xf32, #tpu.memory_space<vmem>>, %arg2: memref<128x128xf32, #tpu.memory_space<vmem>>, %arg3: memref<1x128xf32, #tpu.memory_space<vmem>>, %arg4: memref<128x128xf32, #tpu.memory_space<vmem>>, %arg5: memref<128x128xf32, #tpu.memory_space<vmem>>, %arg6: memref<1x128xf32, #tpu.memory_space<vmem>>, %arg7: memref<64x128xf32, #tpu.memory_space<vmem>>, %arg8: memref<2x8x128xf32, #tpu.memory_space<vmem>>, %arg9: memref<64x128xf32, #tpu.memory_space<vmem>>, %arg10: memref<64x128xf32, #tpu.memory_space<vmem>>) attributes {dimension_semantics = [], scalar_prefetch = 0 : i64, scratch_operands = 2 : i64, tpu.core_type = #tpu.core_type<tc>} {
    %c0 = arith.constant 0 : index
    %c0_0 = arith.constant 0 : index
    %0 = vector.load %arg1[%c0, %c0_0] : memref<128x128xf32, #tpu.memory_space<vmem>>, vector<128x128xf32>
    %cst = arith.constant 0.000000e+00 : f32
    %1 = vector.broadcast %cst : f32 to vector<8x128xf32>
    %c0_i32 = arith.constant 0 : i32
    %c8_i32 = arith.constant 8 : i32
    %2 = arith.muli %c0_i32, %c8_i32 : i32
    %3 = tpu.assume_multiple %2, 8 : i32
    %4 = arith.index_cast %3 : i32 to index
    %c0_1 = arith.constant 0 : index
    %5 = vector.load %arg0[%4, %c0_1] : memref<64x128xf32, #tpu.memory_space<vmem>>, vector<8x128xf32>
    %cst_2 = arith.constant dense<0.000000e+00> : vector<8x128xf32>
    %6 = tpu.matmul %1, %0, %cst_2 {dimension_numbers = #tpu.dot_dimension_numbers<[1], [0], [0], [1], [0, 0, 1, 1], [], []>} : vector<8x128xf32>, vector<128x128xf32>, vector<8x128xf32> -> vector<8x128xf32>
    %7 = arith.addf %5, %6 : vector<8x128xf32>
    %8 = math.tanh %7 : vector<8x128xf32>
    %9 = arith.index_cast %3 : i32 to index
    %c0_3 = arith.constant 0 : index
    %10 = vector.load %arg9[%9, %c0_3] : memref<64x128xf32, #tpu.memory_space<vmem>>, vector<8x128xf32>
    tpu.vector_store %arg9[%9, %c0_3], %8 {strides = array<i32>} : memref<64x128xf32, #tpu.memory_space<vmem>>, vector<8x128xf32>,
    %c1_i32 = arith.constant 1 : i32
    %c8_i32_4 = arith.constant 8 : i32
    %11 = arith.muli %c1_i32, %c8_i32_4 : i32
    %12 = tpu.assume_multiple %11, 8 : i32
    %13 = arith.index_cast %12 : i32 to index
    %c0_5 = arith.constant 0 : index
    %14 = vector.load %arg0[%13, %c0_5] : memref<64x128xf32, #tpu.memory_space<vmem>>, vector<8x128xf32>
    %cst_6 = arith.constant dense<0.000000e+00> : vector<8x128xf32>
    %15 = tpu.matmul %8, %0, %cst_6 {dimension_numbers = #tpu.dot_dimension_numbers<[1], [0], [0], [1], [0, 0, 1, 1], [], []>} : vector<8x128xf32>, vector<128x128xf32>, vector<8x128xf32> -> vector<8x128xf32>
    %16 = arith.addf %14, %15 : vector<8x128xf32>
    %17 = math.tanh %16 : vector<8x128xf32>
    %18 = arith.index_cast %12 : i32 to index
    %c0_7 = arith.constant 0 : index
    %19 = vector.load %arg9[%18, %c0_7] : memref<64x128xf32, #tpu.memory_space<vmem>>, vector<8x128xf32>
    tpu.vector_store %arg9[%18, %c0_7], %17 {strides = array<i32>} : memref<64x128xf32, #tpu.memory_space<vmem>>, vector<8x128xf32>,
    %c2_i32 = arith.constant 2 : i32
    %c8_i32_8 = arith.constant 8 : i32
    %20 = arith.muli %c2_i32, %c8_i32_8 : i32
    %21 = tpu.assume_multiple %20, 8 : i32
    %22 = arith.index_cast %21 : i32 to index
    %c0_9 = arith.constant 0 : index
    %23 = vector.load %arg0[%22, %c0_9] : memref<64x128xf32, #tpu.memory_space<vmem>>, vector<8x128xf32>
    %cst_10 = arith.constant dense<0.000000e+00> : vector<8x128xf32>
    %24 = tpu.matmul %17, %0, %cst_10 {dimension_numbers = #tpu.dot_dimension_numbers<[1], [0], [0], [1], [0, 0, 1, 1], [], []>} : vector<8x128xf32>, vector<128x128xf32>, vector<8x128xf32> -> vector<8x128xf32>
    %25 = arith.addf %23, %24 : vector<8x128xf32>
    %26 = math.tanh %25 : vector<8x128xf32>
    %27 = arith.index_cast %21 : i32 to index
    %c0_11 = arith.constant 0 : index
    %28 = vector.load %arg9[%27, %c0_11] : memref<64x128xf32, #tpu.memory_space<vmem>>, vector<8x128xf32>
    tpu.vector_store %arg9[%27, %c0_11], %26 {strides = array<i32>} : memref<64x128xf32, #tpu.memory_space<vmem>>, vector<8x128xf32>,
    %c3_i32 = arith.constant 3 : i32
    %c8_i32_12 = arith.constant 8 : i32
    %29 = arith.muli %c3_i32, %c8_i32_12 : i32
    %30 = tpu.assume_multiple %29, 8 : i32
    %31 = arith.index_cast %30 : i32 to index
    %c0_13 = arith.constant 0 : index
    %32 = vector.load %arg0[%31, %c0_13] : memref<64x128xf32, #tpu.memory_space<vmem>>, vector<8x128xf32>
    %cst_14 = arith.constant dense<0.000000e+00> : vector<8x128xf32>
    %33 = tpu.matmul %26, %0, %cst_14 {dimension_numbers = #tpu.dot_dimension_numbers<[1], [0], [0], [1], [0, 0, 1, 1], [], []>} : vector<8x128xf32>, vector<128x128xf32>, vector<8x128xf32> -> vector<8x128xf32>
    %34 = arith.addf %32, %33 : vector<8x128xf32>
    %35 = math.tanh %34 : vector<8x128xf32>
    %36 = arith.index_cast %30 : i32 to index
    %c0_15 = arith.constant 0 : index
    %37 = vector.load %arg9[%36, %c0_15] : memref<64x128xf32, #tpu.memory_space<vmem>>, vector<8x128xf32>
    tpu.vector_store %arg9[%36, %c0_15], %35 {strides = array<i32>} : memref<64x128xf32, #tpu.memory_space<vmem>>, vector<8x128xf32>,
    %c4_i32 = arith.constant 4 : i32
    %c8_i32_16 = arith.constant 8 : i32
    %38 = arith.muli %c4_i32, %c8_i32_16 : i32
    %39 = tpu.assume_multiple %38, 8 : i32
    %40 = arith.index_cast %39 : i32 to index
    %c0_17 = arith.constant 0 : index
    %41 = vector.load %arg0[%40, %c0_17] : memref<64x128xf32, #tpu.memory_space<vmem>>, vector<8x128xf32>
    %cst_18 = arith.constant dense<0.000000e+00> : vector<8x128xf32>
    %42 = tpu.matmul %35, %0, %cst_18 {dimension_numbers = #tpu.dot_dimension_numbers<[1], [0], [0], [1], [0, 0, 1, 1], [], []>} : vector<8x128xf32>, vector<128x128xf32>, vector<8x128xf32> -> vector<8x128xf32>
    %43 = arith.addf %41, %42 : vector<8x128xf32>
    %44 = math.tanh %43 : vector<8x128xf32>
    %45 = arith.index_cast %39 : i32 to index
    %c0_19 = arith.constant 0 : index
    %46 = vector.load %arg9[%45, %c0_19] : memref<64x128xf32, #tpu.memory_space<vmem>>, vector<8x128xf32>
    tpu.vector_store %arg9[%45, %c0_19], %44 {strides = array<i32>} : memref<64x128xf32, #tpu.memory_space<vmem>>, vector<8x128xf32>,
    %c5_i32 = arith.constant 5 : i32
    %c8_i32_20 = arith.constant 8 : i32
    %47 = arith.muli %c5_i32, %c8_i32_20 : i32
    %48 = tpu.assume_multiple %47, 8 : i32
    %49 = arith.index_cast %48 : i32 to index
    %c0_21 = arith.constant 0 : index
    %50 = vector.load %arg0[%49, %c0_21] : memref<64x128xf32, #tpu.memory_space<vmem>>, vector<8x128xf32>
    %cst_22 = arith.constant dense<0.000000e+00> : vector<8x128xf32>
    %51 = tpu.matmul %44, %0, %cst_22 {dimension_numbers = #tpu.dot_dimension_numbers<[1], [0], [0], [1], [0, 0, 1, 1], [], []>} : vector<8x128xf32>, vector<128x128xf32>, vector<8x128xf32> -> vector<8x128xf32>
    %52 = arith.addf %50, %51 : vector<8x128xf32>
    %53 = math.tanh %52 : vector<8x128xf32>
    %54 = arith.index_cast %48 : i32 to index
    %c0_23 = arith.constant 0 : index
    %55 = vector.load %arg9[%54, %c0_23] : memref<64x128xf32, #tpu.memory_space<vmem>>, vector<8x128xf32>
    tpu.vector_store %arg9[%54, %c0_23], %53 {strides = array<i32>} : memref<64x128xf32, #tpu.memory_space<vmem>>, vector<8x128xf32>,
    %c6_i32 = arith.constant 6 : i32
    %c8_i32_24 = arith.constant 8 : i32
    %56 = arith.muli %c6_i32, %c8_i32_24 : i32
    %57 = tpu.assume_multiple %56, 8 : i32
    %58 = arith.index_cast %57 : i32 to index
    %c0_25 = arith.constant 0 : index
    %59 = vector.load %arg0[%58, %c0_25] : memref<64x128xf32, #tpu.memory_space<vmem>>, vector<8x128xf32>
    %cst_26 = arith.constant dense<0.000000e+00> : vector<8x128xf32>
    %60 = tpu.matmul %53, %0, %cst_26 {dimension_numbers = #tpu.dot_dimension_numbers<[1], [0], [0], [1], [0, 0, 1, 1], [], []>} : vector<8x128xf32>, vector<128x128xf32>, vector<8x128xf32> -> vector<8x128xf32>
    %61 = arith.addf %59, %60 : vector<8x128xf32>
    %62 = math.tanh %61 : vector<8x128xf32>
    %63 = arith.index_cast %57 : i32 to index
    %c0_27 = arith.constant 0 : index
    %64 = vector.load %arg9[%63, %c0_27] : memref<64x128xf32, #tpu.memory_space<vmem>>, vector<8x128xf32>
    tpu.vector_store %arg9[%63, %c0_27], %62 {strides = array<i32>} : memref<64x128xf32, #tpu.memory_space<vmem>>, vector<8x128xf32>,
    %c7_i32 = arith.constant 7 : i32
    %c8_i32_28 = arith.constant 8 : i32
    %65 = arith.muli %c7_i32, %c8_i32_28 : i32
    %66 = tpu.assume_multiple %65, 8 : i32
    %67 = arith.index_cast %66 : i32 to index
    %c0_29 = arith.constant 0 : index
    %68 = vector.load %arg0[%67, %c0_29] : memref<64x128xf32, #tpu.memory_space<vmem>>, vector<8x128xf32>
    %cst_30 = arith.constant dense<0.000000e+00> : vector<8x128xf32>
    %69 = tpu.matmul %62, %0, %cst_30 {dimension_numbers = #tpu.dot_dimension_numbers<[1], [0], [0], [1], [0, 0, 1, 1], [], []>} : vector<8x128xf32>, vector<128x128xf32>, vector<8x128xf32> -> vector<8x128xf32>
    %70 = arith.addf %68, %69 : vector<8x128xf32>
    %71 = math.tanh %70 : vector<8x128xf32>
    %72 = arith.index_cast %66 : i32 to index
    %c0_31 = arith.constant 0 : index
    %73 = vector.load %arg9[%72, %c0_31] : memref<64x128xf32, #tpu.memory_space<vmem>>, vector<8x128xf32>
    tpu.vector_store %arg9[%72, %c0_31], %71 {strides = array<i32>} : memref<64x128xf32, #tpu.memory_space<vmem>>, vector<8x128xf32>,
    %c8_i32_32 = arith.constant 8 : i32
    %c0_33 = arith.constant 0 : index
    %c0_34 = arith.constant 0 : index
    %c0_35 = arith.constant 0 : index
    %74 = vector.load %arg8[%c0_33, %c0_34, %c0_35] : memref<2x8x128xf32, #tpu.memory_space<vmem>>, vector<1x8x128xf32>
    %75 = vector.shape_cast %74 : vector<1x8x128xf32> to vector<8x128xf32>
    %76 = vector.shape_cast %71 : vector<8x128xf32> to vector<1x8x128xf32>
    tpu.vector_store %arg8[%c0_33, %c0_34, %c0_35], %76 {strides = array<i32>} : memref<2x8x128xf32, #tpu.memory_space<vmem>>, vector<1x8x128xf32>,
    %c0_36 = arith.constant 0 : index
    %c0_37 = arith.constant 0 : index
    %77 = vector.load %arg4[%c0_36, %c0_37] : memref<128x128xf32, #tpu.memory_space<vmem>>, vector<128x128xf32>
    %c0_38 = arith.constant 0 : index
    %c0_39 = arith.constant 0 : index
    %78 = vector.load %arg9[%c0_38, %c0_39] : memref<64x128xf32, #tpu.memory_space<vmem>>, vector<64x128xf32>
    %c0_40 = arith.constant 0 : index
    %c0_41 = arith.constant 0 : index
    %79 = vector.load %arg2[%c0_40, %c0_41] : memref<128x128xf32, #tpu.memory_space<vmem>>, vector<128x128xf32>
    %cst_42 = arith.constant dense<0.000000e+00> : vector<64x128xf32>
    %80 = tpu.matmul %78, %79, %cst_42 {dimension_numbers = #tpu.dot_dimension_numbers<[1], [0], [0], [1], [0, 0, 1, 1], [], []>} : vector<64x128xf32>, vector<128x128xf32>, vector<64x128xf32> -> vector<64x128xf32>
    %c0_43 = arith.constant 0 : index
    %c0_44 = arith.constant 0 : index
    %81 = vector.load %arg3[%c0_43, %c0_44] : memref<1x128xf32, #tpu.memory_space<vmem>>, vector<1x128xf32>
    %82 = vector.broadcast %81 : vector<1x128xf32> to vector<64x128xf32>
    %83 = arith.addf %80, %82 : vector<64x128xf32>
    %c0_45 = arith.constant 0 : index
    %c0_46 = arith.constant 0 : index
    %84 = vector.load %arg10[%c0_45, %c0_46] : memref<64x128xf32, #tpu.memory_space<vmem>>, vector<64x128xf32>
    tpu.vector_store %arg10[%c0_45, %c0_46], %83 {strides = array<i32>} : memref<64x128xf32, #tpu.memory_space<vmem>>, vector<64x128xf32>,
    %cst_47 = arith.constant 0.000000e+00 : f32
    %85 = vector.broadcast %cst_47 : f32 to vector<8x128xf32>
    %c0_i32_48 = arith.constant 0 : i32
    %c8_i32_49 = arith.constant 8 : i32
    %86 = arith.muli %c0_i32_48, %c8_i32_49 : i32
    %87 = tpu.assume_multiple %86, 8 : i32
    %88 = arith.index_cast %87 : i32 to index
    %c0_50 = arith.constant 0 : index
    %89 = vector.load %arg10[%88, %c0_50] : memref<64x128xf32, #tpu.memory_space<vmem>>, vector<8x128xf32>
    %cst_51 = arith.constant dense<0.000000e+00> : vector<8x128xf32>
    %90 = tpu.matmul %85, %77, %cst_51 {dimension_numbers = #tpu.dot_dimension_numbers<[1], [0], [0], [1], [0, 0, 1, 1], [], []>} : vector<8x128xf32>, vector<128x128xf32>, vector<8x128xf32> -> vector<8x128xf32>
    %91 = arith.addf %89, %90 : vector<8x128xf32>
    %92 = math.tanh %91 : vector<8x128xf32>
    %93 = arith.index_cast %87 : i32 to index
    %c0_52 = arith.constant 0 : index
    %94 = vector.load %arg9[%93, %c0_52] : memref<64x128xf32, #tpu.memory_space<vmem>>, vector<8x128xf32>
    tpu.vector_store %arg9[%93, %c0_52], %92 {strides = array<i32>} : memref<64x128xf32, #tpu.memory_space<vmem>>, vector<8x128xf32>,
    %c1_i32_53 = arith.constant 1 : i32
    %c8_i32_54 = arith.constant 8 : i32
    %95 = arith.muli %c1_i32_53, %c8_i32_54 : i32
    %96 = tpu.assume_multiple %95, 8 : i32
    %97 = arith.index_cast %96 : i32 to index
    %c0_55 = arith.constant 0 : index
    %98 = vector.load %arg10[%97, %c0_55] : memref<64x128xf32, #tpu.memory_space<vmem>>, vector<8x128xf32>
    %cst_56 = arith.constant dense<0.000000e+00> : vector<8x128xf32>
    %99 = tpu.matmul %92, %77, %cst_56 {dimension_numbers = #tpu.dot_dimension_numbers<[1], [0], [0], [1], [0, 0, 1, 1], [], []>} : vector<8x128xf32>, vector<128x128xf32>, vector<8x128xf32> -> vector<8x128xf32>
    %100 = arith.addf %98, %99 : vector<8x128xf32>
    %101 = math.tanh %100 : vector<8x128xf32>
    %102 = arith.index_cast %96 : i32 to index
    %c0_57 = arith.constant 0 : index
    %103 = vector.load %arg9[%102, %c0_57] : memref<64x128xf32, #tpu.memory_space<vmem>>, vector<8x128xf32>
    tpu.vector_store %arg9[%102, %c0_57], %101 {strides = array<i32>} : memref<64x128xf32, #tpu.memory_space<vmem>>, vector<8x128xf32>,
    %c2_i32_58 = arith.constant 2 : i32
    %c8_i32_59 = arith.constant 8 : i32
    %104 = arith.muli %c2_i32_58, %c8_i32_59 : i32
    %105 = tpu.assume_multiple %104, 8 : i32
    %106 = arith.index_cast %105 : i32 to index
    %c0_60 = arith.constant 0 : index
    %107 = vector.load %arg10[%106, %c0_60] : memref<64x128xf32, #tpu.memory_space<vmem>>, vector<8x128xf32>
    %cst_61 = arith.constant dense<0.000000e+00> : vector<8x128xf32>
    %108 = tpu.matmul %101, %77, %cst_61 {dimension_numbers = #tpu.dot_dimension_numbers<[1], [0], [0], [1], [0, 0, 1, 1], [], []>} : vector<8x128xf32>, vector<128x128xf32>, vector<8x128xf32> -> vector<8x128xf32>
    %109 = arith.addf %107, %108 : vector<8x128xf32>
    %110 = math.tanh %109 : vector<8x128xf32>
    %111 = arith.index_cast %105 : i32 to index
    %c0_62 = arith.constant 0 : index
    %112 = vector.load %arg9[%111, %c0_62] : memref<64x128xf32, #tpu.memory_space<vmem>>, vector<8x128xf32>
    tpu.vector_store %arg9[%111, %c0_62], %110 {strides = array<i32>} : memref<64x128xf32, #tpu.memory_space<vmem>>, vector<8x128xf32>,
    %c3_i32_63 = arith.constant 3 : i32
    %c8_i32_64 = arith.constant 8 : i32
    %113 = arith.muli %c3_i32_63, %c8_i32_64 : i32
    %114 = tpu.assume_multiple %113, 8 : i32
    %115 = arith.index_cast %114 : i32 to index
    %c0_65 = arith.constant 0 : index
    %116 = vector.load %arg10[%115, %c0_65] : memref<64x128xf32, #tpu.memory_space<vmem>>, vector<8x128xf32>
    %cst_66 = arith.constant dense<0.000000e+00> : vector<8x128xf32>
    %117 = tpu.matmul %110, %77, %cst_66 {dimension_numbers = #tpu.dot_dimension_numbers<[1], [0], [0], [1], [0, 0, 1, 1], [], []>} : vector<8x128xf32>, vector<128x128xf32>, vector<8x128xf32> -> vector<8x128xf32>
    %118 = arith.addf %116, %117 : vector<8x128xf32>
    %119 = math.tanh %118 : vector<8x128xf32>
    %120 = arith.index_cast %114 : i32 to index
    %c0_67 = arith.constant 0 : index
    %121 = vector.load %arg9[%120, %c0_67] : memref<64x128xf32, #tpu.memory_space<vmem>>, vector<8x128xf32>
    tpu.vector_store %arg9[%120, %c0_67], %119 {strides = array<i32>} : memref<64x128xf32, #tpu.memory_space<vmem>>, vector<8x128xf32>,
    %c4_i32_68 = arith.constant 4 : i32
    %c8_i32_69 = arith.constant 8 : i32
    %122 = arith.muli %c4_i32_68, %c8_i32_69 : i32
    %123 = tpu.assume_multiple %122, 8 : i32
    %124 = arith.index_cast %123 : i32 to index
    %c0_70 = arith.constant 0 : index
    %125 = vector.load %arg10[%124, %c0_70] : memref<64x128xf32, #tpu.memory_space<vmem>>, vector<8x128xf32>
    %cst_71 = arith.constant dense<0.000000e+00> : vector<8x128xf32>
    %126 = tpu.matmul %119, %77, %cst_71 {dimension_numbers = #tpu.dot_dimension_numbers<[1], [0], [0], [1], [0, 0, 1, 1], [], []>} : vector<8x128xf32>, vector<128x128xf32>, vector<8x128xf32> -> vector<8x128xf32>
    %127 = arith.addf %125, %126 : vector<8x128xf32>
    %128 = math.tanh %127 : vector<8x128xf32>
    %129 = arith.index_cast %123 : i32 to index
    %c0_72 = arith.constant 0 : index
    %130 = vector.load %arg9[%129, %c0_72] : memref<64x128xf32, #tpu.memory_space<vmem>>, vector<8x128xf32>
    tpu.vector_store %arg9[%129, %c0_72], %128 {strides = array<i32>} : memref<64x128xf32, #tpu.memory_space<vmem>>, vector<8x128xf32>,
    %c5_i32_73 = arith.constant 5 : i32
    %c8_i32_74 = arith.constant 8 : i32
    %131 = arith.muli %c5_i32_73, %c8_i32_74 : i32
    %132 = tpu.assume_multiple %131, 8 : i32
    %133 = arith.index_cast %132 : i32 to index
    %c0_75 = arith.constant 0 : index
    %134 = vector.load %arg10[%133, %c0_75] : memref<64x128xf32, #tpu.memory_space<vmem>>, vector<8x128xf32>
    %cst_76 = arith.constant dense<0.000000e+00> : vector<8x128xf32>
    %135 = tpu.matmul %128, %77, %cst_76 {dimension_numbers = #tpu.dot_dimension_numbers<[1], [0], [0], [1], [0, 0, 1, 1], [], []>} : vector<8x128xf32>, vector<128x128xf32>, vector<8x128xf32> -> vector<8x128xf32>
    %136 = arith.addf %134, %135 : vector<8x128xf32>
    %137 = math.tanh %136 : vector<8x128xf32>
    %138 = arith.index_cast %132 : i32 to index
    %c0_77 = arith.constant 0 : index
    %139 = vector.load %arg9[%138, %c0_77] : memref<64x128xf32, #tpu.memory_space<vmem>>, vector<8x128xf32>
    tpu.vector_store %arg9[%138, %c0_77], %137 {strides = array<i32>} : memref<64x128xf32, #tpu.memory_space<vmem>>, vector<8x128xf32>,
    %c6_i32_78 = arith.constant 6 : i32
    %c8_i32_79 = arith.constant 8 : i32
    %140 = arith.muli %c6_i32_78, %c8_i32_79 : i32
    %141 = tpu.assume_multiple %140, 8 : i32
    %142 = arith.index_cast %141 : i32 to index
    %c0_80 = arith.constant 0 : index
    %143 = vector.load %arg10[%142, %c0_80] : memref<64x128xf32, #tpu.memory_space<vmem>>, vector<8x128xf32>
    %cst_81 = arith.constant dense<0.000000e+00> : vector<8x128xf32>
    %144 = tpu.matmul %137, %77, %cst_81 {dimension_numbers = #tpu.dot_dimension_numbers<[1], [0], [0], [1], [0, 0, 1, 1], [], []>} : vector<8x128xf32>, vector<128x128xf32>, vector<8x128xf32> -> vector<8x128xf32>
    %145 = arith.addf %143, %144 : vector<8x128xf32>
    %146 = math.tanh %145 : vector<8x128xf32>
    %147 = arith.index_cast %141 : i32 to index
    %c0_82 = arith.constant 0 : index
    %148 = vector.load %arg9[%147, %c0_82] : memref<64x128xf32, #tpu.memory_space<vmem>>, vector<8x128xf32>
    tpu.vector_store %arg9[%147, %c0_82], %146 {strides = array<i32>} : memref<64x128xf32, #tpu.memory_space<vmem>>, vector<8x128xf32>,
    %c7_i32_83 = arith.constant 7 : i32
    %c8_i32_84 = arith.constant 8 : i32
    %149 = arith.muli %c7_i32_83, %c8_i32_84 : i32
    %150 = tpu.assume_multiple %149, 8 : i32
    %151 = arith.index_cast %150 : i32 to index
    %c0_85 = arith.constant 0 : index
    %152 = vector.load %arg10[%151, %c0_85] : memref<64x128xf32, #tpu.memory_space<vmem>>, vector<8x128xf32>
    %cst_86 = arith.constant dense<0.000000e+00> : vector<8x128xf32>
    %153 = tpu.matmul %146, %77, %cst_86 {dimension_numbers = #tpu.dot_dimension_numbers<[1], [0], [0], [1], [0, 0, 1, 1], [], []>} : vector<8x128xf32>, vector<128x128xf32>, vector<8x128xf32> -> vector<8x128xf32>
    %154 = arith.addf %152, %153 : vector<8x128xf32>
    %155 = math.tanh %154 : vector<8x128xf32>
    %156 = arith.index_cast %150 : i32 to index
    %c0_87 = arith.constant 0 : index
    %157 = vector.load %arg9[%156, %c0_87] : memref<64x128xf32, #tpu.memory_space<vmem>>, vector<8x128xf32>
    tpu.vector_store %arg9[%156, %c0_87], %155 {strides = array<i32>} : memref<64x128xf32, #tpu.memory_space<vmem>>, vector<8x128xf32>,
    %c8_i32_88 = arith.constant 8 : i32
    %c1 = arith.constant 1 : index
    %c0_89 = arith.constant 0 : index
    %c0_90 = arith.constant 0 : index
    %158 = vector.load %arg8[%c1, %c0_89, %c0_90] : memref<2x8x128xf32, #tpu.memory_space<vmem>>, vector<1x8x128xf32>
    %159 = vector.shape_cast %158 : vector<1x8x128xf32> to vector<8x128xf32>
    %160 = vector.shape_cast %155 : vector<8x128xf32> to vector<1x8x128xf32>
    tpu.vector_store %arg8[%c1, %c0_89, %c0_90], %160 {strides = array<i32>} : memref<2x8x128xf32, #tpu.memory_space<vmem>>, vector<1x8x128xf32>,
    %c0_91 = arith.constant 0 : index
    %c0_92 = arith.constant 0 : index
    %161 = vector.load %arg9[%c0_91, %c0_92] : memref<64x128xf32, #tpu.memory_space<vmem>>, vector<64x128xf32>
    %c0_93 = arith.constant 0 : index
    %c0_94 = arith.constant 0 : index
    %162 = vector.load %arg5[%c0_93, %c0_94] : memref<128x128xf32, #tpu.memory_space<vmem>>, vector<128x128xf32>
    %cst_95 = arith.constant dense<0.000000e+00> : vector<64x128xf32>
    %163 = tpu.matmul %161, %162, %cst_95 {dimension_numbers = #tpu.dot_dimension_numbers<[1], [0], [0], [1], [0, 0, 1, 1], [], []>} : vector<64x128xf32>, vector<128x128xf32>, vector<64x128xf32> -> vector<64x128xf32>
    %c0_96 = arith.constant 0 : index
    %c0_97 = arith.constant 0 : index
    %164 = vector.load %arg6[%c0_96, %c0_97] : memref<1x128xf32, #tpu.memory_space<vmem>>, vector<1x128xf32>
    %165 = vector.broadcast %164 : vector<1x128xf32> to vector<64x128xf32>
    %166 = arith.addf %163, %165 : vector<64x128xf32>
    %c0_98 = arith.constant 0 : index
    %c0_99 = arith.constant 0 : index
    %167 = vector.load %arg7[%c0_98, %c0_99] : memref<64x128xf32, #tpu.memory_space<vmem>>, vector<64x128xf32>
    tpu.vector_store %arg7[%c0_98, %c0_99], %166 {strides = array<i32>} : memref<64x128xf32, #tpu.memory_space<vmem>>, vector<64x128xf32>,
    return
  }
}

</mosaic_0001>

<bundles_post_ra>
// kernel: rnn_forward.1
= control target key start
LH: loop header
LB: loop body
LE: loop exit
PB: predicated region body
PF: predicated region fallthrough
CT: control target
= control target key end

     0   :  { %v673_v16 = vmov 0.0   ;;  %s1323_s1 = inlined_call_operand.vmem [shape: f32[128,128], index: 1, kind: input, shape index: {}]   ;;  %s1324_s0 = inlined_call_operand.vmem [shape: f32[64,128], index: 0, kind: input, shape index: {}]   ;;  %s1325_s2 = inlined_call_operand.vmem [shape: f32[128,128], index: 2, kind: input, shape index: {}]   ;;  %s1326_s4 = inlined_call_operand.vmem [shape: f32[128,128], index: 4, kind: input, shape index: {}]   ;;  %s1327_s3 = inlined_call_operand.vmem [shape: f32[1,128], index: 3, kind: input, shape index: {}]   ;;  %s1328_s5 = inlined_call_operand.vmem [shape: f32[128,128], index: 5, kind: input, shape index: {}]   ;;  %s1329_s8 = inlined_call_operand.vmem [shape: f32[2,8,128], index: 8, kind: output, shape index: {1}]   ;;  %s1330_s6 = inlined_call_operand.vmem [shape: f32[1,128], index: 6, kind: input, shape index: {}]   ;;  %s1331_s7 = inlined_call_operand.vmem [shape: f32[64,128], index: 7, kind: output, shape index: {0}]  }
   0x1   :  { %v722_v0 = vld [vmem:[%s1323_s1 + $0x78] sm:$0xff]  ;;  %v727_v1 = vld [vmem:[%s1323_s1 + $0x70] sm:$0xff]  ;;  %v734_v2 = vld [vmem:[%s1323_s1 + $0x68] sm:$0xff] }
   0x2   :  { %45 = vmatpush.msra.mxu0 %v722_v0  ;;  %70 = vmatpush.msra.mxu1 %v722_v0  ;;  %v743_v3 = vld [vmem:[%s1323_s1 + $0x60] sm:$0xff]  ;;  %v752_v4 = vld [vmem:[%s1323_s1 + $0x58] sm:$0xff]  ;;  %v761_v5 = vld [vmem:[%s1323_s1 + $0x50] sm:$0xff] }
   0x3   :  { %96 = vmatpush.msra.mxu3 %v722_v0  ;;  %200 = vmatpush.msra.mxu2 %v722_v0  ;;  %v770_v6 = vld [vmem:[%s1323_s1 + $0x48] sm:$0xff]  ;;  %v779_v7 = vld [vmem:[%s1323_s1 + $0x40] sm:$0xff]  ;;  %v788_v8 = vld [vmem:[%s1323_s1 + $0x38] sm:$0xff] }
   0x4   :  { %46 = vmatpush.msra.mxu0 %v727_v1  ;;  %71 = vmatpush.msra.mxu1 %v727_v1  ;;  %v797_v9 = vld [vmem:[%s1323_s1 + $0x30] sm:$0xff]  ;;  %v806_v10 = vld [vmem:[%s1323_s1 + $0x28] sm:$0xff]  ;;  %v815_v11 = vld [vmem:[%s1323_s1 + $0x20] sm:$0xff] }
   0x5   :  { %97 = vmatpush.msra.mxu3 %v727_v1  ;;  %201 = vmatpush.msra.mxu2 %v727_v1  ;;  %v824_v12 = vld [vmem:[%s1323_s1 + $0x18] sm:$0xff]  ;;  %v833_v13 = vld [vmem:[%s1323_s1 + $0x10] sm:$0xff]  ;;  %v842_v14 = vld [vmem:[%s1323_s1 + $0x8] sm:$0xff] }
   0x6   :  { %47 = vmatpush.msra.mxu0 %v734_v2  ;;  %72 = vmatpush.msra.mxu1 %v734_v2  ;;  %v851_v15 = vld [vmem:[%s1323_s1] sm:$0xff]  ;;  %v630_v21 = vld [vmem:[%s1324_s0 + $0x8] sm:$0xff]  ;;  %v290_v25 = vld [vmem:[%s1325_s2 + $0x78] sm:$0xff] }
   0x7   :  { %98 = vmatpush.msra.mxu3 %v734_v2  ;;  %202 = vmatpush.msra.mxu2 %v734_v2  ;;  %v44_v17 = vld [vmem:[%s1324_s0] sm:$0xff]  ;;  %v289_v26 = vld [vmem:[%s1325_s2 + $0x70] sm:$0xff]  ;;  %v288_v27 = vld [vmem:[%s1325_s2 + $0x68] sm:$0xff] }
   0x8   :  { %48 = vmatpush.msra.mxu0 %v743_v3  ;;  %73 = vmatpush.msra.mxu1 %v743_v3  ;;  %v287_v28 = vld [vmem:[%s1325_s2 + $0x60] sm:$0xff]  ;;  %v286_v29 = vld [vmem:[%s1325_s2 + $0x58] sm:$0xff]  ;;  %v285_v30 = vld [vmem:[%s1325_s2 + $0x50] sm:$0xff] }
   0x9   :  { %99 = vmatpush.msra.mxu3 %v743_v3  ;;  %203 = vmatpush.msra.mxu2 %v743_v3  ;;  %v284_v31 = vld [vmem:[%s1325_s2 + $0x48] sm:$0xff]  ;;  %v631_v32 = vld [vmem:[%s1324_s0 + $0x10] sm:$0xff]  ;;  %v283_v36 = vld [vmem:[%s1325_s2 + $0x40] sm:$0xff] }
   0xa   :  { %49 = vmatpush.msra.mxu0 %v752_v4  ;;  %74 = vmatpush.msra.mxu1 %v752_v4  ;;  %v282_v37 = vld [vmem:[%s1325_s2 + $0x38] sm:$0xff]  ;;  %v281_v38 = vld [vmem:[%s1325_s2 + $0x30] sm:$0xff]  ;;  %v280_v39 = vld [vmem:[%s1325_s2 + $0x28] sm:$0xff] }
   0xb   :  { %100 = vmatpush.msra.mxu3 %v752_v4  ;;  %204 = vmatpush.msra.mxu2 %v752_v4  ;;  %v279_v40 = vld [vmem:[%s1325_s2 + $0x20] sm:$0xff]  ;;  %v278_v41 = vld [vmem:[%s1325_s2 + $0x18] sm:$0xff]  ;;  %v277_v42 = vld [vmem:[%s1325_s2 + $0x10] sm:$0xff] }
   0xc   :  { %50 = vmatpush.msra.mxu0 %v761_v5  ;;  %75 = vmatpush.msra.mxu1 %v761_v5  ;;  %v276_v43 = vld [vmem:[%s1325_s2 + $0x8] sm:$0xff]  ;;  %v275_v44 = vld [vmem:[%s1325_s2] sm:$0xff]  ;;  %v632_v45 = vld [vmem:[%s1324_s0 + $0x18] sm:$0xff] }
   0xd   :  { %101 = vmatpush.msra.mxu3 %v761_v5  ;;  %205 = vmatpush.msra.mxu2 %v761_v5  ;;  %v1000_v49 = vld [vmem:[%s1326_s4 + $0x78] sm:$0xff]  ;;  %v1005_v50 = vld [vmem:[%s1326_s4 + $0x70] sm:$0xff]  ;;  %v1012_v51 = vld [vmem:[%s1326_s4 + $0x68] sm:$0xff] }
   0xe   :  { %51 = vmatpush.msra.mxu0 %v770_v6  ;;  %76 = vmatpush.msra.mxu1 %v770_v6  ;;  %v1021_v52 = vld [vmem:[%s1326_s4 + $0x60] sm:$0xff]  ;;  %v1030_v53 = vld [vmem:[%s1326_s4 + $0x58] sm:$0xff]  ;;  %v1040_v54 = vld [vmem:[%s1326_s4 + $0x50] sm:$0xff] }
   0xf   :  { %102 = vmatpush.msra.mxu3 %v770_v6  ;;  %206 = vmatpush.msra.mxu2 %v770_v6  ;;  %v1048_v55 = vld [vmem:[%s1326_s4 + $0x48] sm:$0xff]  ;;  %v1066_v56 = vld [vmem:[%s1326_s4 + $0x40] sm:$0xff]  ;;  %v1073_v57 = vld [vmem:[%s1326_s4 + $0x38] sm:$0xff] }
  0x10   :  { %52 = vmatpush.msra.mxu0 %v779_v7  ;;  %77 = vmatpush.msra.mxu1 %v779_v7  ;;  %v1081_v58 = vld [vmem:[%s1326_s4 + $0x30] sm:$0xff]  ;;  %v1087_v59 = vld [vmem:[%s1326_s4 + $0x28] sm:$0xff]  ;;  %v1100_v60 = vld [vmem:[%s1326_s4 + $0x20] sm:$0xff] }
  0x11   :  { %103 = vmatpush.msra.mxu3 %v779_v7  ;;  %207 = vmatpush.msra.mxu2 %v779_v7  ;;  %v1109_v61 = vld [vmem:[%s1326_s4 + $0x18] sm:$0xff]  ;;  %v1114_v62 = vld [vmem:[%s1326_s4 + $0x10] sm:$0xff]  ;;  %v1123_v63 = vld [vmem:[%s1326_s4 + $0x8] sm:$0xff] }
  0x12   :  { %53 = vmatpush.msra.mxu0 %v788_v8  ;;  %78 = vmatpush.msra.mxu1 %v788_v8 }
  0x13   :  { %104 = vmatpush.msra.mxu3 %v788_v8  ;;  %208 = vmatpush.msra.mxu2 %v788_v8 }
  0x14   :  { %54 = vmatpush.msra.mxu0 %v797_v9  ;;  %79 = vmatpush.msra.mxu1 %v797_v9 }
  0x15   :  { %105 = vmatpush.msra.mxu3 %v797_v9  ;;  %209 = vmatpush.msra.mxu2 %v797_v9 }
  0x16   :  { %55 = vmatpush.msra.mxu0 %v806_v10  ;;  %80 = vmatpush.msra.mxu1 %v806_v10 }
  0x17   :  { %106 = vmatpush.msra.mxu3 %v806_v10  ;;  %210 = vmatpush.msra.mxu2 %v806_v10 }
  0x18   :  { %56 = vmatpush.msra.mxu0 %v815_v11  ;;  %81 = vmatpush.msra.mxu1 %v815_v11 }
  0x19   :  { %107 = vmatpush.msra.mxu3 %v815_v11  ;;  %211 = vmatpush.msra.mxu2 %v815_v11 }
  0x1a   :  { %57 = vmatpush.msra.mxu0 %v824_v12  ;;  %82 = vmatpush.msra.mxu1 %v824_v12 }
  0x1b   :  { %108 = vmatpush.msra.mxu3 %v824_v12  ;;  %212 = vmatpush.msra.mxu2 %v824_v12 }
  0x1c   :  { %58 = vmatpush.msra.mxu0 %v833_v13  ;;  %83 = vmatpush.msra.mxu1 %v833_v13 }
  0x1d   :  { %109 = vmatpush.msra.mxu3 %v833_v13  ;;  %213 = vmatpush.msra.mxu2 %v833_v13 }
  0x1e   :  { %59 = vmatpush.msra.mxu0 %v842_v14  ;;  %84 = vmatpush.msra.mxu1 %v842_v14 }
  0x1f   :  { %110 = vmatpush.msra.mxu3 %v842_v14  ;;  %214 = vmatpush.msra.mxu2 %v842_v14 }
  0x20   :  { %60 = vmatpush.msra.mxu0 %v851_v15  ;;  %85 = vmatpush.msra.mxu1 %v851_v15 }
  0x21   :  { %61 = vmatmul.f32.vlgmr.msra.gmra.mxu0 %v673_v16  ;;  %111 = vmatpush.msra.mxu3 %v851_v15 }
  0x22   :  { %148 = vmatpush.msrb.mxu0 %v722_v0  ;;  %174 = vmatpush.msrb.mxu1 %v722_v0 }
  0x23   :  { %122 = vmatpush.msrb.mxu3 %v722_v0  ;;  %215 = vmatpush.msra.mxu2 %v851_v15 }
  0x24   :  { %149 = vmatpush.msrb.mxu0 %v727_v1  ;;  %175 = vmatpush.msrb.mxu1 %v727_v1 }
  0x25   :  { %123 = vmatpush.msrb.mxu3 %v727_v1  ;;  %370 = vmatpush.msrb.mxu2 %v1000_v49 }
  0x26   :  { %150 = vmatpush.msrb.mxu0 %v734_v2  ;;  %176 = vmatpush.msrb.mxu1 %v734_v2 }
  0x27   :  { %124 = vmatpush.msrb.mxu3 %v734_v2  ;;  %371 = vmatpush.msrb.mxu2 %v1005_v50 }
  0x28   :  { %151 = vmatpush.msrb.mxu0 %v743_v3  ;;  %177 = vmatpush.msrb.mxu1 %v743_v3 }
  0x29   :  { %125 = vmatpush.msrb.mxu3 %v743_v3  ;;  %372 = vmatpush.msrb.mxu2 %v1012_v51 }
  0x2a   :  { %152 = vmatpush.msrb.mxu0 %v752_v4  ;;  %178 = vmatpush.msrb.mxu1 %v752_v4 }
  0x2b   :  { %126 = vmatpush.msrb.mxu3 %v752_v4  ;;  %373 = vmatpush.msrb.mxu2 %v1021_v52 }
  0x2c   :  { %153 = vmatpush.msrb.mxu0 %v761_v5  ;;  %179 = vmatpush.msrb.mxu1 %v761_v5 }
  0x2d   :  { %127 = vmatpush.msrb.mxu3 %v761_v5  ;;  %374 = vmatpush.msrb.mxu2 %v1030_v53 }
  0x2e   :  { %154 = vmatpush.msrb.mxu0 %v770_v6  ;;  %180 = vmatpush.msrb.mxu1 %v770_v6 }
  0x2f   :  { %128 = vmatpush.msrb.mxu3 %v770_v6  ;;  %375 = vmatpush.msrb.mxu2 %v1040_v54 }
  0x30   :  { %155 = vmatpush.msrb.mxu0 %v779_v7  ;;  %181 = vmatpush.msrb.mxu1 %v779_v7 }
  0x31   :  { %129 = vmatpush.msrb.mxu3 %v779_v7  ;;  %376 = vmatpush.msrb.mxu2 %v1048_v55 }
  0x32   :  { %156 = vmatpush.msrb.mxu0 %v788_v8  ;;  %182 = vmatpush.msrb.mxu1 %v788_v8 }
  0x33   :  { %130 = vmatpush.msrb.mxu3 %v788_v8  ;;  %377 = vmatpush.msrb.mxu2 %v1066_v56 }
  0x34   :  { %157 = vmatpush.msrb.mxu0 %v797_v9  ;;  %183 = vmatpush.msrb.mxu1 %v797_v9 }
  0x35   :  { %131 = vmatpush.msrb.mxu3 %v797_v9  ;;  %378 = vmatpush.msrb.mxu2 %v1073_v57 }
  0x36   :  { %158 = vmatpush.msrb.mxu0 %v806_v10  ;;  %184 = vmatpush.msrb.mxu1 %v806_v10 }
  0x37   :  { %132 = vmatpush.msrb.mxu3 %v806_v10  ;;  %379 = vmatpush.msrb.mxu2 %v1081_v58 }
  0x38   :  { %159 = vmatpush.msrb.mxu0 %v815_v11  ;;  %185 = vmatpush.msrb.mxu1 %v815_v11 }
  0x39   :  { %133 = vmatpush.msrb.mxu3 %v815_v11  ;;  %380 = vmatpush.msrb.mxu2 %v1087_v59 }
  0x3a   :  { %160 = vmatpush.msrb.mxu0 %v824_v12  ;;  %186 = vmatpush.msrb.mxu1 %v824_v12 }
  0x3b   :  { %134 = vmatpush.msrb.mxu3 %v824_v12  ;;  %381 = vmatpush.msrb.mxu2 %v1100_v60 }
  0x3c   :  { %161 = vmatpush.msrb.mxu0 %v833_v13  ;;  %187 = vmatpush.msrb.mxu1 %v833_v13 }
  0x3d   :  { %135 = vmatpush.msrb.mxu3 %v833_v13  ;;  %382 = vmatpush.msrb.mxu2 %v1109_v61 }
  0x3e   :  { %162 = vmatpush.msrb.mxu0 %v842_v14  ;;  %188 = vmatpush.msrb.mxu1 %v842_v14 }
  0x3f   :  { %136 = vmatpush.msrb.mxu3 %v842_v14  ;;  %383 = vmatpush.msrb.mxu2 %v1114_v62 }
  0x40   :  { %163 = vmatpush.msrb.mxu0 %v851_v15  ;;  %189 = vmatpush.msrb.mxu1 %v851_v15 }
  0x41   :  { %137 = vmatpush.msrb.mxu3 %v851_v15  ;;  %384 = vmatpush.msrb.mxu2 %v1123_v63 }
  0x42   :  { %295 = vmatpush.msra.mxu0 %v290_v25  ;;  %v567_v25 = vld [vmem:[%s1328_s5 + $0x70] sm:$0xff] }
  0x44   :  { %296 = vmatpush.msra.mxu0 %v289_v26  ;;  %v566_v26 = vld [vmem:[%s1328_s5 + $0x68] sm:$0xff] }
  0x46   :  { %297 = vmatpush.msra.mxu0 %v288_v27  ;;  %v636_v27 = vld [vmem:[%s1324_s0 + $0x38] sm:$0xff] }
  0x48   :  { %298 = vmatpush.msra.mxu0 %v287_v28 }
  0x4a   :  { %299 = vmatpush.msra.mxu0 %v286_v29 }
  0x4c   :  { %300 = vmatpush.msra.mxu0 %v285_v30 }
  0x4e   :  { %301 = vmatpush.msra.mxu0 %v284_v31 }
  0x50   :  { %302 = vmatpush.msra.mxu0 %v283_v36  ;;  %v565_v36 = vld [vmem:[%s1328_s5 + $0x60] sm:$0xff] }
  0x52   :  { %303 = vmatpush.msra.mxu0 %v282_v37  ;;  %v564_v37 = vld [vmem:[%s1328_s5 + $0x58] sm:$0xff] }
  0x54   :  { %304 = vmatpush.msra.mxu0 %v281_v38  ;;  %v563_v38 = vld [vmem:[%s1328_s5 + $0x50] sm:$0xff] }
  0x56   :  { %305 = vmatpush.msra.mxu0 %v280_v39  ;;  %v562_v39 = vld [vmem:[%s1328_s5 + $0x48] sm:$0xff] }
  0x58   :  { %306 = vmatpush.msra.mxu0 %v279_v40  ;;  %v561_v40 = vld [vmem:[%s1328_s5 + $0x40] sm:$0xff] }
  0x5a   :  { %307 = vmatpush.msra.mxu0 %v278_v41  ;;  %v560_v41 = vld [vmem:[%s1328_s5 + $0x38] sm:$0xff] }
  0x5c   :  { %308 = vmatpush.msra.mxu0 %v277_v42  ;;  %v559_v42 = vld [vmem:[%s1328_s5 + $0x30] sm:$0xff] }
  0x5e   :  { %309 = vmatpush.msra.mxu0 %v276_v43  ;;  %v558_v43 = vld [vmem:[%s1328_s5 + $0x28] sm:$0xff] }
  0x60   :  { %310 = vmatpush.msra.mxu0 %v275_v44  ;;  %v557_v44 = vld [vmem:[%s1328_s5 + $0x20] sm:$0xff] }
  0x9e   :  { %v62_v18 = vpop.f32.mrf.mxu0 }
  0x9f   :  { %v65_v19 = vadd.f32 %v62_v18, %v44_v17 }
  0xa1   :  { %641 = vtanh.f32 %v65_v19 }
  0xa7   :  { %v915_v20 = vpop.eup %641 }
  0xa8   :  { %86 = vmatmul.f32.vlgmr.msra.gmra.mxu1 %v915_v20 }
  0xa9   :  { %345 = vmatpush.msra.mxu1 %v1000_v49 }
  0xab   :  { %346 = vmatpush.msra.mxu1 %v1005_v50 }
  0xad   :  { %347 = vmatpush.msra.mxu1 %v1012_v51 }
  0xaf   :  { %348 = vmatpush.msra.mxu1 %v1021_v52 }
  0xb1   :  { %349 = vmatpush.msra.mxu1 %v1030_v53 }
  0xb3   :  { %350 = vmatpush.msra.mxu1 %v1040_v54 }
  0xb5   :  { %351 = vmatpush.msra.mxu1 %v1048_v55 }
  0xb7   :  { %352 = vmatpush.msra.mxu1 %v1066_v56 }
  0xb9   :  { %353 = vmatpush.msra.mxu1 %v1073_v57 }
  0xbb   :  { %354 = vmatpush.msra.mxu1 %v1081_v58 }
  0xbd   :  { %355 = vmatpush.msra.mxu1 %v1087_v59 }
  0xbf   :  { %356 = vmatpush.msra.mxu1 %v1100_v60 }
  0xc1   :  { %357 = vmatpush.msra.mxu1 %v1109_v61 }
  0xc3   :  { %358 = vmatpush.msra.mxu1 %v1114_v62 }
  0xc5   :  { %359 = vmatpush.msra.mxu1 %v1123_v63 }
 0x125   :  { %v87_v22 = vpop.f32.mrf.mxu1 }
 0x126   :  { %v90_v23 = vadd.f32 %v630_v21, %v87_v22 }
 0x128   :  { %643 = vtanh.f32 %v90_v23 }
 0x12e   :  { %v921_v24 = vpop.eup %643 }
 0x12f   :  { %112 = vmatmul.f32.vlgmr.msra.gmra.mxu3 %v921_v24 }
 0x130   :  { %226 = vmatpush.msra.mxu3 %v722_v0  ;;  %v1136_v0 = vld [vmem:[%s1326_s4] sm:$0xff] }
 0x131   :  { %360 = vmatpush.msra.mxu1 %v1136_v0  ;;  %385 = vmatpush.msrb.mxu2 %v1136_v0 }
 0x132   :  { %227 = vmatpush.msra.mxu3 %v727_v1  ;;  %v633_v1 = vld [vmem:[%s1324_s0 + $0x20] sm:$0xff] }
 0x134   :  { %228 = vmatpush.msra.mxu3 %v734_v2 }
 0x136   :  { %229 = vmatpush.msra.mxu3 %v743_v3 }
 0x138   :  { %230 = vmatpush.msra.mxu3 %v752_v4 }
 0x13a   :  { %231 = vmatpush.msra.mxu3 %v761_v5  ;;  %v634_v5 = vld [vmem:[%s1324_s0 + $0x28] sm:$0xff] }
 0x13c   :  { %232 = vmatpush.msra.mxu3 %v770_v6 }
 0x13e   :  { %233 = vmatpush.msra.mxu3 %v779_v7 }
 0x140   :  { %234 = vmatpush.msra.mxu3 %v788_v8  ;;  %v1186_v8 = vld [vmem:[%s1327_s3] ss:$0 sm:$0xff] }
 0x142   :  { %235 = vmatpush.msra.mxu3 %v797_v9 }
 0x144   :  { %236 = vmatpush.msra.mxu3 %v806_v10 }
 0x146   :  { %237 = vmatpush.msra.mxu3 %v815_v11 }
 0x148   :  { %238 = vmatpush.msra.mxu3 %v824_v12 }
 0x14a   :  { %239 = vmatpush.msra.mxu3 %v833_v13 }
 0x14c   :  { %240 = vmatpush.msra.mxu3 %v842_v14 }
 0x14e   :  { %241 = vmatpush.msra.mxu3 %v851_v15  ;;  %v635_v15 = vld [vmem:[%s1324_s0 + $0x30] sm:$0xff] }
 0x1b2   :  { %v113_v33 = vpop.f32.mrf.mxu3 }
 0x1b3   :  { %v116_v34 = vadd.f32 %v631_v32, %v113_v33 }
 0x1b5   :  { %645 = vtanh.f32 %v116_v34 }
 0x1bb   :  { %v964_v35 = vpop.eup %645 }
 0x1bc   :  { %138 = vmatmul.f32.vlgmr.msrb.gmra.mxu3 %v964_v35 }
 0x1bd   :  { %395 = vmatpush.msrb.mxu3 %v1000_v49 }
 0x1bf   :  { %396 = vmatpush.msrb.mxu3 %v1005_v50 }
 0x1c1   :  { %397 = vmatpush.msrb.mxu3 %v1012_v51 }
 0x1c3   :  { %398 = vmatpush.msrb.mxu3 %v1021_v52 }
 0x1c5   :  { %399 = vmatpush.msrb.mxu3 %v1030_v53 }
 0x1c7   :  { %400 = vmatpush.msrb.mxu3 %v1040_v54 }
 0x1c9   :  { %401 = vmatpush.msrb.mxu3 %v1048_v55 }
 0x1cb   :  { %402 = vmatpush.msrb.mxu3 %v1066_v56 }
 0x1cd   :  { %403 = vmatpush.msrb.mxu3 %v1073_v57 }
 0x1cf   :  { %404 = vmatpush.msrb.mxu3 %v1081_v58 }
 0x1d1   :  { %405 = vmatpush.msrb.mxu3 %v1087_v59 }
 0x1d3   :  { %406 = vmatpush.msrb.mxu3 %v1100_v60 }
 0x1d5   :  { %407 = vmatpush.msrb.mxu3 %v1109_v61 }
 0x1d7   :  { %408 = vmatpush.msrb.mxu3 %v1114_v62 }
 0x1d9   :  { %409 = vmatpush.msrb.mxu3 %v1123_v63 }
 0x1db   :  { %410 = vmatpush.msrb.mxu3 %v1136_v0 }
 0x23f   :  { %v139_v46 = vpop.f32.mrf.mxu3 }
 0x240   :  { %v142_v47 = vadd.f32 %v632_v45, %v139_v46  ;;  %v556_v45 = vld [vmem:[%s1328_s5 + $0x18] sm:$0xff]  ;;  %v555_v46 = vld [vmem:[%s1328_s5 + $0x10] sm:$0xff] }
 0x242   :  { %647 = vtanh.f32 %v142_v47  ;;  %v554_v47 = vld [vmem:[%s1328_s5 + $0x8] sm:$0xff] }
 0x248   :  { %v648_v48 = vpop.eup %647 }
 0x249   :  { %164 = vmatmul.f32.vlgmr.msrb.gmra.mxu0 %v648_v48 }
 0x24a   :  { %495 = vmatpush.msrb.mxu0 %v1000_v49 }
 0x24c   :  { %496 = vmatpush.msrb.mxu0 %v1005_v50 }
 0x24e   :  { %497 = vmatpush.msrb.mxu0 %v1012_v51 }
 0x250   :  { %498 = vmatpush.msrb.mxu0 %v1021_v52 }
 0x251   :  { %311 = vmatmul.f32.vlgmr.msra.gmra.mxu0 %v915_v20 }
 0x252   :  { %499 = vmatpush.msrb.mxu0 %v1030_v53 }
 0x254   :  { %500 = vmatpush.msrb.mxu0 %v1040_v54 }
 0x256   :  { %501 = vmatpush.msrb.mxu0 %v1048_v55 }
 0x258   :  { %502 = vmatpush.msrb.mxu0 %v1066_v56 }
 0x259   :  { %314 = vmatmul.f32.gmra.mxu0 %v921_v24  ;;  %v568_v24 = vld [vmem:[%s1328_s5 + $0x78] sm:$0xff] }
 0x25a   :  { %503 = vmatpush.msrb.mxu0 %v1073_v57 }
 0x25c   :  { %504 = vmatpush.msrb.mxu0 %v1081_v58 }
 0x25e   :  { %505 = vmatpush.msrb.mxu0 %v1087_v59 }
 0x260   :  { %506 = vmatpush.msrb.mxu0 %v1100_v60 }
 0x261   :  { %317 = vmatmul.f32.gmra.mxu0 %v964_v35 }
 0x262   :  { %507 = vmatpush.msrb.mxu0 %v1109_v61 }
 0x264   :  { %508 = vmatpush.msrb.mxu0 %v1114_v62 }
 0x266   :  { %509 = vmatpush.msrb.mxu0 %v1123_v63 }
 0x268   :  { %510 = vmatpush.msrb.mxu0 %v1136_v0 }
 0x269   :  { %320 = vmatmul.f32.gmra.mxu0 %v648_v48  ;;  %v553_v48 = vld [vmem:[%s1328_s5] sm:$0xff] }
 0x2c6   :  { %v165_v2 = vpop.f32.mrf.mxu0 }
 0x2c7   :  { %v168_v3 = vadd.f32 %v633_v1, %v165_v2 }
 0x2c9   :  { %649 = vtanh.f32 %v168_v3 }
 0x2ce   :  { %v312_v9 = vpop.f32.mrf.mxu0 }
 0x2cf   :  { %v650_v4 = vpop.eup %649  ;;  %v313_v10 = vadd.f32 %v1186_v8, %v312_v9 }
 0x2d0   :  { %190 = vmatmul.f32.vlgmr.msrb.gmra.mxu1 %v650_v4  ;;  %323 = vmatmul.f32.gmra.mxu0 %v650_v4 }
 0x2d1   :  { %420 = vmatpush.msrb.mxu1 %v1000_v49 }
 0x2d3   :  { %421 = vmatpush.msrb.mxu1 %v1005_v50 }
 0x2d5   :  { %422 = vmatpush.msrb.mxu1 %v1012_v51 }
 0x2d6   :  { %v315_v18 = vpop.f32.mrf.mxu0 }
 0x2d7   :  { %423 = vmatpush.msrb.mxu1 %v1021_v52  ;;  %v316_v19 = vadd.f32 %v1186_v8, %v315_v18 }
 0x2d8   :  { %361 = vmatmul.f32.vlgmr.msra.gmra.mxu1 %v673_v16 }
 0x2d9   :  { %424 = vmatpush.msrb.mxu1 %v1030_v53 }
 0x2db   :  { %425 = vmatpush.msrb.mxu1 %v1040_v54 }
 0x2dd   :  { %426 = vmatpush.msrb.mxu1 %v1048_v55 }
 0x2de   :  { %v318_v30 = vpop.f32.mrf.mxu0 }
 0x2df   :  { %427 = vmatpush.msrb.mxu1 %v1066_v56  ;;  %v319_v31 = vadd.f32 %v1186_v8, %v318_v30 }
 0x2e1   :  { %428 = vmatpush.msrb.mxu1 %v1073_v57 }
 0x2e3   :  { %429 = vmatpush.msrb.mxu1 %v1081_v58 }
 0x2e5   :  { %430 = vmatpush.msrb.mxu1 %v1087_v59 }
 0x2e7   :  { %431 = vmatpush.msrb.mxu1 %v1100_v60 }
 0x2e9   :  { %432 = vmatpush.msrb.mxu1 %v1109_v61 }
 0x2eb   :  { %433 = vmatpush.msrb.mxu1 %v1114_v62 }
 0x2ed   :  { %434 = vmatpush.msrb.mxu1 %v1123_v63 }
 0x2ef   :  { %435 = vmatpush.msrb.mxu1 %v1136_v0 }
 0x2f1   :  { %520 = vmatpush.msra.mxu1 %v1000_v49 }
 0x2f3   :  { %521 = vmatpush.msra.mxu1 %v1005_v50 }
 0x2f5   :  { %522 = vmatpush.msra.mxu1 %v1012_v51 }
 0x2f7   :  { %523 = vmatpush.msra.mxu1 %v1021_v52 }
 0x2f9   :  { %524 = vmatpush.msra.mxu1 %v1030_v53 }
 0x2fb   :  { %525 = vmatpush.msra.mxu1 %v1040_v54 }
 0x2fd   :  { %526 = vmatpush.msra.mxu1 %v1048_v55 }
 0x2ff   :  { %527 = vmatpush.msra.mxu1 %v1066_v56 }
 0x301   :  { %528 = vmatpush.msra.mxu1 %v1073_v57 }
 0x303   :  { %529 = vmatpush.msra.mxu1 %v1081_v58 }
 0x305   :  { %530 = vmatpush.msra.mxu1 %v1087_v59 }
 0x307   :  { %531 = vmatpush.msra.mxu1 %v1100_v60 }
 0x309   :  { %532 = vmatpush.msra.mxu1 %v1109_v61 }
 0x30b   :  { %533 = vmatpush.msra.mxu1 %v1114_v62 }
 0x30d   :  { %534 = vmatpush.msra.mxu1 %v1123_v63 }
 0x30f   :  { %535 = vmatpush.msra.mxu1 %v1136_v0 }
 0x34d   :  { %v191_v6 = vpop.f32.mrf.mxu1 }
 0x34e   :  { %v194_v7 = vadd.f32 %v634_v5, %v191_v6 }
 0x350   :  { %651 = vtanh.f32 %v194_v7 }
 0x355   :  { %v362_v11 = vpop.f32.mrf.mxu1 }
 0x356   :  { %v652_v12 = vpop.eup %651  ;;  %v365_v13 = vadd.f32 %v362_v11, %v313_v10 }
 0x357   :  { %216 = vmatmul.f32.vlgmr.msra.gmra.mxu2 %v652_v12  ;;  %326 = vmatmul.f32.gmra.mxu0 %v652_v12 }
 0x358   :  { %653 = vtanh.f32 %v365_v13  ;;  %445 = vmatpush.msra.mxu2 %v1000_v49 }
 0x35a   :  { %446 = vmatpush.msra.mxu2 %v1005_v50 }
 0x35c   :  { %447 = vmatpush.msra.mxu2 %v1012_v51 }
 0x35e   :  { %v1192_v14 = vpop.eup %653  ;;  %448 = vmatpush.msra.mxu2 %v1021_v52 }
 0x35f   :  { %386 = vmatmul.f32.vlgmr.msrb.gmra.mxu2 %v1192_v14 }
 0x360   :  { %449 = vmatpush.msra.mxu2 %v1030_v53 }
 0x362   :  { %450 = vmatpush.msra.mxu2 %v1040_v54 }
 0x364   :  { %451 = vmatpush.msra.mxu2 %v1048_v55 }
 0x366   :  { %452 = vmatpush.msra.mxu2 %v1066_v56 }
 0x368   :  { %453 = vmatpush.msra.mxu2 %v1073_v57 }
 0x36a   :  { %454 = vmatpush.msra.mxu2 %v1081_v58 }
 0x36c   :  { %455 = vmatpush.msra.mxu2 %v1087_v59 }
 0x36e   :  { %456 = vmatpush.msra.mxu2 %v1100_v60 }
 0x370   :  { %457 = vmatpush.msra.mxu2 %v1109_v61 }
 0x372   :  { %458 = vmatpush.msra.mxu2 %v1114_v62 }
 0x374   :  { %459 = vmatpush.msra.mxu2 %v1123_v63 }
 0x376   :  { %460 = vmatpush.msra.mxu2 %v1136_v0 }
 0x378   :  { %573 = vmatpush.msrb.mxu2 %v568_v24 }
 0x37a   :  { %574 = vmatpush.msrb.mxu2 %v567_v25 }
 0x37c   :  { %575 = vmatpush.msrb.mxu2 %v566_v26 }
 0x37e   :  { %576 = vmatpush.msrb.mxu2 %v565_v36 }
 0x380   :  { %577 = vmatpush.msrb.mxu2 %v564_v37 }
 0x382   :  { %578 = vmatpush.msrb.mxu2 %v563_v38 }
 0x384   :  { %579 = vmatpush.msrb.mxu2 %v562_v39 }
 0x386   :  { %580 = vmatpush.msrb.mxu2 %v561_v40 }
 0x388   :  { %581 = vmatpush.msrb.mxu2 %v560_v41 }
 0x38a   :  { %582 = vmatpush.msrb.mxu2 %v559_v42 }
 0x38c   :  { %583 = vmatpush.msrb.mxu2 %v558_v43 }
 0x38e   :  { %584 = vmatpush.msrb.mxu2 %v557_v44 }
 0x390   :  { %585 = vmatpush.msrb.mxu2 %v556_v45 }
 0x392   :  { %586 = vmatpush.msrb.mxu2 %v555_v46 }
 0x394   :  { %587 = vmatpush.msrb.mxu2 %v554_v47 }
 0x396   :  { %588 = vmatpush.msrb.mxu2 %v553_v48 }
 0x3da   :  { %v217_v16 = vpop.f32.mrf.mxu2 }
 0x3db   :  { %v220_v17 = vadd.f32 %v635_v15, %v217_v16 }
 0x3dd   :  { %655 = vtanh.f32 %v220_v17 }
 0x3e2   :  { %v387_v20 = vpop.f32.mrf.mxu2 }
 0x3e3   :  { %v656_v21 = vpop.eup %655  ;;  %v390_v22 = vadd.f32 %v387_v20, %v316_v19 }
 0x3e4   :  { %242 = vmatmul.f32.vlgmr.msra.gmra.mxu3 %v656_v21  ;;  %329 = vmatmul.f32.gmra.mxu0 %v656_v21 }
 0x3e5   :  { %657 = vtanh.f32 %v390_v22  ;;  %470 = vmatpush.msra.mxu3 %v1000_v49  ;;  %v321_v49 = vpop.f32.mrf.mxu0 }
 0x3e7   :  { %471 = vmatpush.msra.mxu3 %v1005_v50  ;;  %v322_v50 = vadd.f32 %v1186_v8, %v321_v49 }
 0x3e9   :  { %472 = vmatpush.msra.mxu3 %v1012_v51 }
 0x3eb   :  { %v1215_v23 = vpop.eup %657  ;;  %473 = vmatpush.msra.mxu3 %v1021_v52 }
 0x3ec   :  { %411 = vmatmul.f32.vlgmr.msrb.gmra.mxu3 %v1215_v23 }
 0x3ed   :  { %474 = vmatpush.msra.mxu3 %v1030_v53 }
 0x3ef   :  { %475 = vmatpush.msra.mxu3 %v1040_v54  ;;  %v324_v54 = vpop.f32.mrf.mxu0 }
 0x3f1   :  { %476 = vmatpush.msra.mxu3 %v1048_v55  ;;  %v325_v55 = vadd.f32 %v1186_v8, %v324_v54 }
 0x3f3   :  { %477 = vmatpush.msra.mxu3 %v1066_v56 }
 0x3f5   :  { %478 = vmatpush.msra.mxu3 %v1073_v57 }
 0x3f7   :  { %479 = vmatpush.msra.mxu3 %v1081_v58  ;;  %v640_v58 = vld [vmem:[%s1330_s6] ss:$0 sm:$0xff]  ;;  %v327_v4 = vpop.f32.mrf.mxu0 }
 0x3f8   :  { %v328_v5 = vadd.f32 %v1186_v8, %v327_v4 }
 0x3f9   :  { %480 = vmatpush.msra.mxu3 %v1087_v59 }
 0x3fb   :  { %481 = vmatpush.msra.mxu3 %v1100_v60 }
 0x3fd   :  { %482 = vmatpush.msra.mxu3 %v1109_v61 }
 0x3ff   :  { %483 = vmatpush.msra.mxu3 %v1114_v62 }
 0x401   :  { %484 = vmatpush.msra.mxu3 %v1123_v63 }
 0x403   :  { %485 = vmatpush.msra.mxu3 %v1136_v0 }
 0x461   :  { %v330_v12 = vpop.f32.mrf.mxu0 }
 0x467   :  { %v243_v28 = vpop.f32.mrf.mxu3 }
 0x468   :  { %v246_v29 = vadd.f32 %v636_v27, %v243_v28 }
 0x46a   :  { %659 = vtanh.f32 %v246_v29 }
 0x46f   :  { %v412_v32 = vpop.f32.mrf.mxu3 }
 0x470   :  { %v660_v33 = vpop.eup %659  ;;  %v415_v34 = vadd.f32 %v412_v32, %v319_v31 }
 0x471   :  { %250 = vst [vmem:[%s1329_s8] sm:$0xff] %v660_v33  ;;  %332 = vmatmul.f32.gmra.mxu0 %v660_v33 }
 0x472   :  { %661 = vtanh.f32 %v415_v34 }
 0x478   :  { %v662_v35 = vpop.eup %661 }
 0x479   :  { %436 = vmatmul.f32.vlgmr.msrb.gmra.mxu1 %v662_v35 }
 0x4ee   :  { %v333_v13 = vpop.f32.mrf.mxu0 }
 0x4ef   :  { %v334_v20 = vadd.f32 %v1186_v8, %v333_v13 }
 0x4f6   :  { %v437_v51 = vpop.f32.mrf.mxu1 }
 0x4f7   :  { %v440_v52 = vadd.f32 %v437_v51, %v322_v50 }
 0x4f9   :  { %663 = vtanh.f32 %v440_v52 }
 0x4ff   :  { %v664_v53 = vpop.eup %663 }
 0x500   :  { %461 = vmatmul.f32.vlgmr.msra.gmra.mxu2 %v664_v53 }
 0x508   :  { %589 = vmatmul.f32.vlgmr.msrb.gmra.mxu2 %v1192_v14  ;;  %v331_v14 = vadd.f32 %v1186_v8, %v330_v12 }
 0x510   :  { %592 = vmatmul.f32.gmra.mxu2 %v1215_v23 }
 0x518   :  { %595 = vmatmul.f32.gmra.mxu2 %v662_v35 }
 0x520   :  { %598 = vmatmul.f32.gmra.mxu2 %v664_v53 }
 0x583   :  { %v462_v56 = vpop.f32.mrf.mxu2 }
 0x584   :  { %v465_v57 = vadd.f32 %v462_v56, %v325_v55 }
 0x586   :  { %665 = vtanh.f32 %v465_v57 }
 0x58b   :  { %v590_v59 = vpop.f32.mrf.mxu2 }
 0x58c   :  { %v666_v60 = vpop.eup %665  ;;  %v591_v61 = vadd.f32 %v640_v58, %v590_v59 }
 0x58d   :  { %486 = vmatmul.f32.vlgmr.msra.gmra.mxu3 %v666_v60  ;;  %601 = vmatmul.f32.gmra.mxu2 %v666_v60 }
 0x58e   :  { %614 = vst [vmem:[%s1331_s7] sm:$0xff] %v591_v61 }
 0x593   :  { %v593_v62 = vpop.f32.mrf.mxu2 }
 0x594   :  { %v594_v63 = vadd.f32 %v640_v58, %v593_v62 }
 0x596   :  { %615 = vst [vmem:[%s1331_s7 + $0x8] sm:$0xff] %v594_v63 }
 0x59b   :  { %v596_v0 = vpop.f32.mrf.mxu2 }
 0x59c   :  { %v597_v1 = vadd.f32 %v640_v58, %v596_v0 }
 0x59e   :  { %616 = vst [vmem:[%s1331_s7 + $0x10] sm:$0xff] %v597_v1 }
 0x5a3   :  { %v599_v2 = vpop.f32.mrf.mxu2 }
 0x5a4   :  { %v600_v3 = vadd.f32 %v640_v58, %v599_v2 }
 0x5a6   :  { %617 = vst [vmem:[%s1331_s7 + $0x18] sm:$0xff] %v600_v3 }
 0x610   :  { %v487_v6 = vpop.f32.mrf.mxu3  ;;  %v602_v7 = vpop.f32.mrf.mxu2 }
 0x611   :  { %v490_v9 = vadd.f32 %v487_v6, %v328_v5  ;;  %v603_v10 = vadd.f32 %v640_v58, %v602_v7 }
 0x613   :  { %667 = vtanh.f32 %v490_v9  ;;  %618 = vst [vmem:[%s1331_s7 + $0x20] sm:$0xff] %v603_v10 }
 0x619   :  { %v668_v11 = vpop.eup %667 }
 0x61a   :  { %511 = vmatmul.f32.vlgmr.msrb.gmra.mxu0 %v668_v11  ;;  %604 = vmatmul.f32.gmra.mxu2 %v668_v11 }
 0x697   :  { %v512_v15 = vpop.f32.mrf.mxu0 }
 0x698   :  { %v515_v16 = vadd.f32 %v512_v15, %v331_v14 }
 0x69a   :  { %669 = vtanh.f32 %v515_v16 }
 0x69d   :  { %v605_v17 = vpop.f32.mrf.mxu2 }
 0x69e   :  { %v606_v18 = vadd.f32 %v640_v58, %v605_v17 }
 0x6a0   :  { %v670_v19 = vpop.eup %669  ;;  %619 = vst [vmem:[%s1331_s7 + $0x28] sm:$0xff] %v606_v18 }
 0x6a1   :  { %536 = vmatmul.f32.vlgmr.msra.gmra.mxu1 %v670_v19  ;;  %607 = vmatmul.f32.gmra.mxu2 %v670_v19 }
 0x71e   :  { %v537_v21 = vpop.f32.mrf.mxu1 }
 0x71f   :  { %v540_v22 = vadd.f32 %v537_v21, %v334_v20 }
 0x721   :  { %671 = vtanh.f32 %v540_v22 }
 0x724   :  { %v608_v23 = vpop.f32.mrf.mxu2 }
 0x725   :  { %v609_v24 = vadd.f32 %v640_v58, %v608_v23 }
 0x727   :  { %v672_v25 = vpop.eup %671  ;;  %620 = vst [vmem:[%s1331_s7 + $0x30] sm:$0xff] %v609_v24 }
 0x728   :  { %637 = vst [vmem:[%s1329_s8 + $0x8] sm:$0xff] %v672_v25  ;;  %610 = vmatmul.f32.gmra.mxu2 %v672_v25 }
 0x7ab   :  { %v611_v26 = vpop.f32.mrf.mxu2 }
 0x7ac   :  { %v612_v27 = vadd.f32 %v640_v58, %v611_v26 }
 0x7ae   :  { %621 = vst [vmem:[%s1331_s7 + $0x38] sm:$0xff] %v612_v27 }

</bundles_post_ra>
